<compile_context>
chip_gen: v6e
topology: v6e:2x2x1
jax: 0.10.0
libtpu: 0.0.40
codegen_flags: <defaults>
</compile_context>

<pallas_src>
import functools

import jax
import jax.numpy as jnp
from jax import lax
from jax.experimental import pallas as pl
from jax.experimental.pallas import tpu as pltpu


def _round_up(x, m):
    return (x + m - 1) // m * m


def _tpu_params():
    """(physical VMEM bytes, TensorCore count) with conservative fallbacks."""
    vmem = 64 * 1024 * 1024      # v7x per-TC size: the safe lower bound
    cores = 1
    try:
        info = pltpu.get_tpu_info()
        v = getattr(info, "vmem_capacity_bytes", None)
        if isinstance(v, int) and v > 0:
            vmem = v
        for name in ("num_tensorcores", "num_cores", "tensorcore_count"):
            c = getattr(info, name, None)
            if isinstance(c, int) and c > 0:
                cores = c
                break
    except Exception:
        pass
    return vmem, cores


def _choose_tiles(batch, dim, itemsize, vmem_limit, num_cores):
    """Returns (tile_q, tile_k, b_pad); tile_k is a multiple of tile_q and
    divides b_pad, so the only k tile that can contain padded columns is the
    last one and it always has >= 1 valid column."""
    min_sub = 8 if itemsize >= 4 else (16 if itemsize == 2 else 32)

    def vmem_bytes(tq, tk):
        # double-buffered q/d input tiles + f32 score/exp temporaries + output.
        return (2 * (tq + tk) * dim * itemsize
                + 3 * tq * tk * 4
                + 4 * tq * 4)

    budget = int(vmem_limit * 0.7)

    # tile_q: as large as possible (arithmetic intensity on the streamed doc
    # operand), capped at 512, rounded to the dtype sublane packing; keep the
    # parallel i axis >= num_cores blocks when more than one TensorCore.
    tq = min(512, _round_up(batch, min_sub))
    tq = max(min_sub, (tq // min_sub) * min_sub)
    if num_cores > 1:
        while tq > min_sub and _round_up(batch, tq) // tq < num_cores:
            tq = max(min_sub, ((tq // 2) // min_sub) * min_sub)
    while tq > min_sub and vmem_bytes(tq, tq) > budget:
        tq = max(min_sub, ((tq // 2) // min_sub) * min_sub)

    b_pad = _round_up(batch, tq)
    nq = b_pad // tq

    # tile_k: the largest multiple m of tile_q that divides b_pad, fits VMEM
    # and is <= 2048 -- it is streamed, so bigger tiles just amortize the
    # per-grid-step overhead and per-step LSE bookkeeping.
    best_m = 1
    for m in range(1, nq + 1):
        if nq % m != 0:
            continue
        tk = tq * m
        if m > 1 and tk > 2048:
            continue
        if vmem_bytes(tq, tk) <= budget:
            best_m = m
    tile_k = tq * best_m
    return tq, tile_k, b_pad


def _lse_kernel(q_ref, d_ref, lse_ref, m_ref, l_ref, *, valid_b, block_k):
    """Online logsumexp over doc tiles. q is pre-scaled by 1/temperature."""
    j = pl.program_id(1)
    nk = pl.num_programs(1)

    @pl.when(j == 0)
    def _init():
        m_ref[...] = jnp.full(m_ref.shape, -jnp.inf, dtype=jnp.float32)
        l_ref[...] = jnp.zeros(l_ref.shape, dtype=jnp.float32)

    # logits tile: contraction over D with a transposed-RHS dot_general
    # (no d.T materialization); operands stay in native dtype (bf16 MXU fast
    # path), accumulation in f32.
    s = lax.dot_general(
        q_ref[...], d_ref[...],
        dimension_numbers=(((1,), (1,)), ((), ())),
        preferred_element_type=jnp.float32)          # (tile_q, tile_k) f32

    def _online_update(scores):
        m_prev = m_ref[...]
        m_new = jnp.maximum(m_prev, jnp.max(scores, axis=-1, keepdims=True))
        alpha = jnp.exp(m_prev - m_new)              # == 0 on the first step
        p = jnp.exp(scores - m_new)
        l_ref[...] = alpha * l_ref[...] + jnp.sum(p, axis=-1, keepdims=True)
        m_ref[...] = m_new

    if valid_b is None:
        _online_update(s)
    else:
        # Only the last doc tile contains padded columns: gate the mask so
        # interior steps skip the iota/cmp/select work.
        @pl.when(j < nk - 1)
        def _interior():
            _online_update(s)

        @pl.when(j == nk - 1)
        def _last():
            col = j * block_k + lax.broadcasted_iota(jnp.int32, s.shape, 1)
            _online_update(
                jnp.where(col < valid_b, s, jnp.float32(-jnp.inf)))

    @pl.when(j == nk - 1)
    def _finalize():
        lse_ref[...] = m_ref[...] + jnp.log(l_ref[...])


def bi_encoder_loss(query_embeddings, doc_embeddings, temperature: float = 0.02,
                    *, tile_q: int = None, tile_k: int = None):
    """query_embeddings, doc_embeddings: (B, D) -> scalar f32 loss."""
    assert query_embeddings.shape == doc_embeddings.shape
    assert query_embeddings.dtype == doc_embeddings.dtype
    batch, dim = query_embeddings.shape
    dtype = query_embeddings.dtype
    itemsize = jnp.dtype(dtype).itemsize
    inv_temperature = 1.0 / float(temperature)

    vmem_phys, num_cores = _tpu_params()
    vmem_limit = min(int(vmem_phys * 0.78), 100 * 1024 * 1024)

    if tile_q is None or tile_k is None:
        tile_q, tile_k, b_pad = _choose_tiles(
            batch, dim, itemsize, vmem_limit, num_cores)
    else:
        assert tile_q % 8 == 0 and tile_k % tile_q == 0
        b_pad = _round_up(batch, tile_k)

    # Fold the temperature into q once (tiny O(B*D) XLA op); keep the MXU
    # operands in their native dtype.
    q_scaled = (query_embeddings.astype(jnp.float32)
                * inv_temperature).astype(dtype)

    q = q_scaled
    d = doc_embeddings
    if b_pad != batch:
        pad = b_pad - batch
        q = jnp.pad(q, ((0, pad), (0, 0)))
        d = jnp.pad(d, ((0, pad), (0, 0)))

    grid = (b_pad // tile_q, b_pad // tile_k)
    kernel = functools.partial(
        _lse_kernel,
        valid_b=(batch if b_pad != batch else None),
        block_k=tile_k)

    lse = pl.pallas_call(
        kernel,
        out_shape=jax.ShapeDtypeStruct((b_pad, 1), jnp.float32),
        grid_spec=pltpu.PrefetchScalarGridSpec(
            num_scalar_prefetch=0,
            grid=grid,
            in_specs=[
                # query tile: resident across the doc axis
                pl.BlockSpec((tile_q, dim), lambda i, j: (i, 0)),
                # doc tile: streamed (double-buffered) along the doc axis
                pl.BlockSpec((tile_k, dim), lambda i, j: (j, 0)),
            ],
            out_specs=pl.BlockSpec((tile_q, 1), lambda i, j: (i, 0)),
            scratch_shapes=[
                pltpu.VMEM((tile_q, 1), jnp.float32),   # running max
                pltpu.VMEM((tile_q, 1), jnp.float32),   # running sum of exp
            ]),
        compiler_params=pltpu.CompilerParams(
            dimension_semantics=("parallel", "arbitrary"),
            vmem_limit_bytes=vmem_limit),
    )(q, d)

    # Label logit = diagonal of the scaled score matrix: one fused O(B*D)
    # elementwise-multiply + row-reduce in XLA (uses the same pre-scaled q so
    # it is self-consistent with the kernel's logits).
    diag = jnp.sum(q_scaled.astype(jnp.float32)
                   * doc_embeddings.astype(jnp.float32), axis=-1)

    # Mean cross-entropy over the real (unpadded) rows; world_size == 1 so no
    # extra scaling / label offset.
    return jnp.mean(lse[:batch, 0] - diag)


def _reference_loss(q, d, temperature=0.02):
    logits = (q.astype(jnp.float32) @ d.astype(jnp.float32).T) / temperature
    lse = jax.scipy.special.logsumexp(logits, axis=-1)
    return jnp.mean(lse - jnp.diagonal(logits))


if __name__ == "__main__":
    key = jax.random.PRNGKey(0)
    k1, k2, k3, k4 = jax.random.split(key, 4)

    def _norm(x):
        return x / jnp.linalg.norm(x, axis=-1, keepdims=True)

    # Test 1: small single-tile case (B=8, D=128), f32.
    B, D = 8, 128
    q = _norm(jax.random.normal(k1, (B, D), jnp.float32))
    d = _norm(jax.random.normal(k2, (B, D), jnp.float32))
    loss = bi_encoder_loss(q, d, temperature=0.02)
    jax.block_until_ready(loss)
    ref = _reference_loss(q, d, temperature=0.02)
    assert jnp.allclose(loss, ref, rtol=1e-3, atol=1e-3), (loss, ref)

    # Test 2: auto-chosen tiles (single big tile, no padding) at B=160.
    B2, D2 = 160, 128
    q2 = _norm(jax.random.normal(k3, (B2, D2), jnp.float32))
    d2 = _norm(jax.random.normal(k4, (B2, D2), jnp.float32))
    loss2 = bi_encoder_loss(q2, d2, temperature=0.02)
    jax.block_until_ready(loss2)
    ref2 = _reference_loss(q2, d2, temperature=0.02)
    assert jnp.allclose(loss2, ref2, rtol=1e-3, atol=1e-3), (loss2, ref2)

    # Test 3: forced multi-tile grid (4 x 2) with padding -> exercises the
    # online LSE across doc tiles, the unmasked interior path and the
    # pl.when-gated last-tile column mask.
    loss3 = bi_encoder_loss(q2, d2, temperature=0.02, tile_q=64, tile_k=128)
    jax.block_until_ready(loss3)
    assert jnp.allclose(loss3, ref2, rtol=1e-3, atol=1e-3), (loss3, ref2)

    # Test 4: bf16 operands on the MXU fast path (f32 accumulation),
    # 16-sublane tile rounding + padded-column masking.
    qb = q.astype(jnp.bfloat16)
    db = d.astype(jnp.bfloat16)
    loss4 = bi_encoder_loss(qb, db, temperature=0.02)
    jax.block_until_ready(loss4)
    ref4 = _reference_loss(qb, db, temperature=0.02)
    assert jnp.allclose(loss4, ref4, rtol=1e-1, atol=2e-1), (loss4, ref4)

    print("KERNEL_OK")
</pallas_src>

<mosaic_0001>
module attributes {stable_mosaic.version = 11 : i64} {
  func.func @_lse_kernel(%arg0: i32, %arg1: i32, %arg2: memref<8x128xf32, #tpu.memory_space<vmem>>, %arg3: memref<8x128xf32, #tpu.memory_space<vmem>>, %arg4: memref<8x1xf32, #tpu.memory_space<vmem>>, %arg5: memref<8x1xf32, #tpu.memory_space<vmem>>, %arg6: memref<8x1xf32, #tpu.memory_space<vmem>>) attributes {dimension_semantics = [#tpu.dimension_semantics<parallel>, #tpu.dimension_semantics<arbitrary>], iteration_bounds = array<i64: 1, 1>, scalar_prefetch = 0 : i64, scratch_operands = 2 : i64, tpu.core_type = #tpu.core_type<tc>, window_params = [{transform_indices = @transform_0, window_bounds = array<i64: 8, 128>}, {transform_indices = @transform_1, window_bounds = array<i64: 8, 128>}, {transform_indices = @transform_2, window_bounds = array<i64: 8, 1>}]} {
    %c0_i32 = arith.constant 0 : i32
    %0 = arith.cmpi eq, %arg1, %c0_i32 : i32
    %1 = arith.extui %0 : i1 to i32
    %c0_i32_0 = arith.constant 0 : i32
    %2 = arith.cmpi ne, %1, %c0_i32_0 : i32
    scf.if %2 {
      %cst_16 = arith.constant 0xFF800000 : f32
      %25 = vector.broadcast %cst_16 : f32 to vector<8x1xf32>
      %c0_17 = arith.constant 0 : index
      %c0_18 = arith.constant 0 : index
      %26 = vector.load %arg5[%c0_17, %c0_18] : memref<8x1xf32, #tpu.memory_space<vmem>>, vector<8x1xf32>
      tpu.vector_store %arg5[%c0_17, %c0_18], %25 {strides = array<i32>} : memref<8x1xf32, #tpu.memory_space<vmem>>, vector<8x1xf32>,
      %cst_19 = arith.constant 0.000000e+00 : f32
      %27 = vector.broadcast %cst_19 : f32 to vector<8x1xf32>
      %c0_20 = arith.constant 0 : index
      %c0_21 = arith.constant 0 : index
      %28 = vector.load %arg6[%c0_20, %c0_21] : memref<8x1xf32, #tpu.memory_space<vmem>>, vector<8x1xf32>
      tpu.vector_store %arg6[%c0_20, %c0_21], %27 {strides = array<i32>} : memref<8x1xf32, #tpu.memory_space<vmem>>, vector<8x1xf32>,
    } else {
    }
    %c0 = arith.constant 0 : index
    %c0_1 = arith.constant 0 : index
    %3 = vector.load %arg2[%c0, %c0_1] : memref<8x128xf32, #tpu.memory_space<vmem>>, vector<8x128xf32>
    %c0_2 = arith.constant 0 : index
    %c0_3 = arith.constant 0 : index
    %4 = vector.load %arg3[%c0_2, %c0_3] : memref<8x128xf32, #tpu.memory_space<vmem>>, vector<8x128xf32>
    %cst = arith.constant dense<0.000000e+00> : vector<8x8xf32>
    %5 = tpu.matmul %3, %4, %cst {dimension_numbers = #tpu.dot_dimension_numbers<[1], [1], [0], [0], [0, 0, 1, 0], [], []>} : vector<8x128xf32>, vector<8x128xf32>, vector<8x8xf32> -> vector<8x8xf32>
    %c0_4 = arith.constant 0 : index
    %c0_5 = arith.constant 0 : index
    %6 = vector.load %arg5[%c0_4, %c0_5] : memref<8x1xf32, #tpu.memory_space<vmem>>, vector<8x1xf32>
    %cst_6 = arith.constant dense<0xFF800000> : vector<8xf32>
    %7 = vector.multi_reduction <maximumf>, %5, %cst_6 [1] : vector<8x8xf32> to vector<8xf32>
    %8 = vector.shape_cast %7 : vector<8xf32> to vector<8x1xf32>
    %9 = arith.maximumf %6, %8 : vector<8x1xf32>
    %10 = arith.subf %6, %9 : vector<8x1xf32>
    %11 = math.exp %10 : vector<8x1xf32>
    %12 = vector.broadcast %9 : vector<8x1xf32> to vector<8x8xf32>
    %13 = arith.subf %5, %12 : vector<8x8xf32>
    %14 = math.exp %13 : vector<8x8xf32>
    %c0_7 = arith.constant 0 : index
    %c0_8 = arith.constant 0 : index
    %15 = vector.load %arg6[%c0_7, %c0_8] : memref<8x1xf32, #tpu.memory_space<vmem>>, vector<8x1xf32>
    %16 = arith.mulf %11, %15 : vector<8x1xf32>
    %cst_9 = arith.constant dense<0.000000e+00> : vector<8xf32>
    %17 = vector.multi_reduction <add>, %14, %cst_9 [1] : vector<8x8xf32> to vector<8xf32>
    %18 = vector.shape_cast %17 : vector<8xf32> to vector<8x1xf32>
    %19 = arith.addf %16, %18 : vector<8x1xf32>
    %c0_10 = arith.constant 0 : index
    %c0_11 = arith.constant 0 : index
    %20 = vector.load %arg6[%c0_10, %c0_11] : memref<8x1xf32, #tpu.memory_space<vmem>>, vector<8x1xf32>
    tpu.vector_store %arg6[%c0_10, %c0_11], %19 {strides = array<i32>} : memref<8x1xf32, #tpu.memory_space<vmem>>, vector<8x1xf32>,
    %c0_12 = arith.constant 0 : index
    %c0_13 = arith.constant 0 : index
    %21 = vector.load %arg5[%c0_12, %c0_13] : memref<8x1xf32, #tpu.memory_space<vmem>>, vector<8x1xf32>
    tpu.vector_store %arg5[%c0_12, %c0_13], %9 {strides = array<i32>} : memref<8x1xf32, #tpu.memory_space<vmem>>, vector<8x1xf32>,
    %c0_i32_14 = arith.constant 0 : i32
    %22 = arith.cmpi eq, %arg1, %c0_i32_14 : i32
    %23 = arith.extui %22 : i1 to i32
    %c0_i32_15 = arith.constant 0 : i32
    %24 = arith.cmpi ne, %23, %c0_i32_15 : i32
    scf.if %24 {
      %c0_16 = arith.constant 0 : index
      %c0_17 = arith.constant 0 : index
      %25 = vector.load %arg5[%c0_16, %c0_17] : memref<8x1xf32, #tpu.memory_space<vmem>>, vector<8x1xf32>
      %c0_18 = arith.constant 0 : index
      %c0_19 = arith.constant 0 : index
      %26 = vector.load %arg6[%c0_18, %c0_19] : memref<8x1xf32, #tpu.memory_space<vmem>>, vector<8x1xf32>
      %27 = math.log %26 : vector<8x1xf32>
      %28 = arith.addf %25, %27 : vector<8x1xf32>
      %c0_20 = arith.constant 0 : index
      %c0_21 = arith.constant 0 : index
      %29 = vector.load %arg4[%c0_20, %c0_21] : memref<8x1xf32, #tpu.memory_space<vmem>>, vector<8x1xf32>
      tpu.vector_store %arg4[%c0_20, %c0_21], %28 {strides = array<i32>} : memref<8x1xf32, #tpu.memory_space<vmem>>, vector<8x1xf32>,
    } else {
    }
    return
  }
  func.func @transform_0(%arg0: i32, %arg1: i32) -> (i32, i32) {
    %c0_i32 = arith.constant 0 : i32
    %c0_i32_0 = arith.constant 0 : i32
    return %arg0, %c0_i32 : i32, i32
  }
  func.func @transform_1(%arg0: i32, %arg1: i32) -> (i32, i32) {
    %c0_i32 = arith.constant 0 : i32
    %c0_i32_0 = arith.constant 0 : i32
    return %arg1, %c0_i32 : i32, i32
  }
  func.func @transform_2(%arg0: i32, %arg1: i32) -> (i32, i32) {
    %c0_i32 = arith.constant 0 : i32
    %c0_i32_0 = arith.constant 0 : i32
    return %arg0, %c0_i32 : i32, i32
  }
}

</mosaic_0001>

<bundles_post_ra>
// kernel: tpu_custom_call.1
= control target key start
LH: loop header
LB: loop body
LE: loop exit
PB: predicated region body
PF: predicated region fallthrough
CT: control target
= control target key end

     0   :  { %7 = vsyncpa [#allocation5], 0  ;;  %s256_s0 = inlined_call_operand.hbm [shape: f32[8,128], index: 0, kind: input, shape index: {}]   ;;  %s257_s1 = inlined_call_operand.hbm [shape: f32[8,128], index: 1, kind: input, shape index: {}]   ;;  %s258_s2 = inlined_call_operand.vmem [shape: f32[8,1], index: 2, kind: output, shape index: {}]  }
   0x1   :  { %8 = vsyncpa [#allocation7], 0  ;;  %s219_s9 = smov [#allocation4]   ;;  %s220_s11 = smov [#allocation6]  }
   0x2   :  { %s15_s10 = sshll.u32 %s219_s9, 4  ;;  %s25_s12 = sshll.u32 %s220_s11, 4  ;;  %s16_s10 = int_to_ptr.vmem [resolvable:$true] %s15_s10  ;;  %s26_s12 = int_to_ptr.vmem [resolvable:$true] %s25_s12 }
   0x3   :  { %s183_s13 = scalar_lea.vmem %s16_s10, 128  ;;  %p188_p1 = scmp.lt.s32.totalorder %s16_s10, %s16_s10 }
   0x4   :  { %p184_p0 = scmp.ne.s32.totalorder %s16_s10, %s183_s13  ;;  %p189_p2 = scmp.lt.s32.totalorder %s183_s13, %s183_s13 }
   0x6   :  { %p190_p3 = por %p189_p2, %p188_p1 }
   0x8   :  { %p191_p4 = pnand %p190_p3, %p184_p0 }
   0xa   :  { %194 = shalt.err (!%p191_p4)
}
   0xb   :  { %18 = dma.hbm_to_vmem [thread:$0]  %s256_s0, 128, %s16_s10, [#allocation5]  }
   0xc   :  { %s203_s16 = scalar_lea.vmem %s26_s12, 128  ;;  %p208_p6 = scmp.lt.s32.totalorder %s26_s12, %s26_s12 }
   0xd   :  { %p204_p5 = scmp.ne.s32.totalorder %s26_s12, %s203_s16  ;;  %p209_p7 = scmp.lt.s32.totalorder %s203_s16, %s203_s16 }
   0xf   :  { %p210_p8 = por %p209_p7, %p208_p6 }
  0x11   :  { %p211_p9 = pnand %p210_p8, %p204_p5 }
  0x13   :  { %214 = shalt.err (!%p211_p9)
}
  0x14   :  { %28 = dma.hbm_to_vmem [thread:$0]  %s257_s1, 128, %s26_s12, [#allocation7]  }
  0x15   :  { %215 = dma.done.wait [#allocation5], 128  }
  0x16   :  { %216 = vsyncadd [#allocation5], 4294967168 }
  0x17   :  { %217 = dma.done.wait [#allocation7], 128  }
  0x18   :  { %218 = vsyncadd [#allocation7], 4294967168  ;;  %vm39_vm0 = vcmask 7168   ;;  %v221_v0 = vmov 0.0   ;;  %vm222_vm1 = vmmov 0   ;;  %v43_v1 = vld [vmem:[#allocation6] sm:$0xff] }
  0x19   :  { %41 = vst.msk [vmem:[#allocation3] sm:$0xff] %vm39_vm0, %v221_v0  ;;  %157 = vmatprep.subr.mxu0 %v221_v0  ;;  %159 = vmatprep.mubr.msk.f32.mxu0 %vm222_vm1, %v221_v0  ;;  %v42_v2 = vld [vmem:[#allocation4] sm:$0xff]  ;;  %v223_v3 = vmov -inf   ;;  %vm115_vm2 = vcmask 64512   ;;  %v224_v7 = vmov 0  }
  0x1a   :  { %158 = vmatpush3.xpose.msra.mxu0 %v43_v1  ;;  %40 = vst.msk [vmem:[#allocation2] sm:$0xff] %vm39_vm0, %v223_v3  ;;  %168 = vset.pattern.permute.xlu0 %v224_v7 }
  0x1d   :  { %160 = vmatmul.mubr.f32.vlgmr.msra.gmra.mxu0 %v42_v2 }
  0x20   :  { %v131_v19 = vld [vmem:[#allocation3] sm:$0xff] }
  0x21   :  { %v114_v8 = vld [vmem:[#allocation2] sm:$0xff] }
  0xdd   :  { %v110_v4 = vpop.f32.mrf.mxu0 }
  0xde   :  { %v116_v5 = vsel %vm115_vm2, %v110_v4, -inf }
  0xdf   :  { %117 = vmax.xlane.f32.xlu0 %v116_v5  ;;  %v161_v6 = vpop.f32.mrf.mxu0 }
 0x168   :  { %v118_v9 = vpop.xlane.xlu0 %117 }
 0x169   :  { %v119_v10 = vmax.f32 %v114_v8, %v118_v9 }
 0x16b   :  { %v120_v11 = vsub.f32 %v114_v8, %v119_v10  ;;  %139 = vst.msk [vmem:[#allocation2] sm:$0xff] %vm39_vm0, %v119_v10  ;;  %125 = vperm.xlu0 %168, %v119_v10  }
 0x16d   :  { %v121_v17 = vmul.f32 1.442695, %v120_v11 }
 0x172   :  { %v143_v26 = vld [vmem:[#allocation2] sm:$0xff] }
 0x1e6   :  { %v126_v12 = vpop.permute.xlu0 %125 }
 0x1e7   :  { %v128_v13 = vsub.f32 %v110_v4, %v126_v12 }
 0x1e9   :  { %v129_v14 = vmul.f32 1.442695, %v128_v13 }
 0x1eb   :  { %169 = vpow2.f32 %v129_v14 }
 0x1ec   :  { %171 = vpow2.f32 %v121_v17 }
 0x1f8   :  { %v170_v15 = vpop.eup %169 }
 0x1f9   :  { %v133_v16 = vsel %vm115_vm2, %v170_v15, 0.0  ;;  %v172_v18 = vpop.eup %171 }
 0x1fa   :  { %134 = vadd.xlane.f32.xlu1 %v133_v16  ;;  %v132_v20 = vmul.f32 %v172_v18, %v131_v19 }
 0x283   :  { %v135_v21 = vpop.xlane.xlu1 %134 }
 0x284   :  { %v136_v22 = vadd.f32 %v135_v21, %v132_v20 }
 0x286   :  { %138 = vst.msk [vmem:[#allocation3] sm:$0xff] %vm39_vm0, %v136_v22 }
 0x28d   :  { %v144_v23 = vld [vmem:[#allocation3] sm:$0xff] }
 0x28e   :  { %173 = vlog2.f32 %v144_v23 }
 0x29b   :  { %v174_v24 = vpop.eup %173 }
 0x29c   :  { %v146_v25 = vmul.f32 0.6931472, %v174_v24 }
 0x29e   :  { %v147_v27 = vadd.f32 %v146_v25, %v143_v26 }
 0x2a0   :  { %148 = vst.msk [vmem:[%s258_s2] sm:$0xff] %vm39_vm0, %v147_v27 }
 0x2a1   :  { %153 = vsyncpa [#allocation5], 1 }
 0x2a2   :  { %154 = vsyncpa [#allocation7], 1 }

</bundles_post_ra>
